<compile_context>
chip_gen: v5e
topology: v5e:2x2
jax: 0.10.0
libtpu: 0.0.40
codegen_flags: <defaults>
</compile_context>

<pallas_src>
import jax
import jax.numpy as jnp
from jax.experimental import pallas as pl
from jax.experimental.pallas import tpu as pltpu


def _fused_conv_block_kernel(x_ref, b1_ref, s1_ref, b2_ref, s2_ref, o_ref,
                             xpad_ref, ypad_ref):
    # x_ref:  (N, H, W*Cin)        bf16  input, row-flattened (w, c)
    # b1_ref: (3*W*Cin,  W*Cout)   bf16  layer-1 kh-concatenated banded weights
    # s1_ref: (1, W*Cout)          f32   layer-1 folded BN shift (tiled over w)
    # b2_ref: (3*W*Cout, W*Cout)   bf16  layer-2 kh-concatenated banded weights
    # s2_ref: (1, W*Cout)          f32   layer-2 folded BN shift
    # o_ref:  (N, H, W*Cout)       f32   output, row-flattened (w, c), lane-dense
    # xpad_ref: (N*S + 16, W*Cin)  bf16  scratch; image n at rows [n*S+16, n*S+16+H)
    # ypad_ref: (N*S + 16, W*Cout) bf16  scratch for the layer-1 activation
    n_img, H, wcin = x_ref.shape
    wcout = o_ref.shape[2]
    S = (xpad_ref.shape[0] - 16) // n_img       # slab stride (multiple of 16)
    m_mm = (n_img - 1) * S + H                  # matmul M (all images + gap rows)

    # --- scatter the batch into the padded scratch; all stores 16-row aligned.
    xpad_ref[0:16, :] = jnp.zeros((16, wcin), xpad_ref.dtype)
    ypad_ref[0:16, :] = jnp.zeros((16, wcout), ypad_ref.dtype)
    for n in range(n_img):                      # static unroll (N known at trace)
        base = n * S + 16
        xpad_ref[base + H:base + S, :] = jnp.zeros((S - H, wcin), xpad_ref.dtype)
        ypad_ref[base + H:base + S, :] = jnp.zeros((S - H, wcout), ypad_ref.dtype)
        xpad_ref[base:base + H, :] = x_ref[n]   # bf16 -> bf16, no cast

    # --- layer 1: one deep-K MXU matmul (im2col over kh) + shift + ReLU
    lhs1 = jnp.concatenate(
        [xpad_ref[15 + kh:15 + kh + m_mm, :] for kh in range(3)], axis=1)
    y1 = jnp.maximum(
        jnp.dot(lhs1, b1_ref[...], preferred_element_type=jnp.float32)
        + s1_ref[...], 0.0)
    y1 = y1.astype(ypad_ref.dtype)              # single f32 -> bf16 cast

    # --- layer 2: intermediate stays in VMEM, never written to HBM
    for n in range(n_img):
        base = n * S + 16
        ypad_ref[base:base + H, :] = y1[n * S:n * S + H, :]
    lhs2 = jnp.concatenate(
        [ypad_ref[15 + kh:15 + kh + m_mm, :] for kh in range(3)], axis=1)
    y2 = jnp.maximum(
        jnp.dot(lhs2, b2_ref[...], preferred_element_type=jnp.float32)
        + s2_ref[...], 0.0)

    for n in range(n_img):
        o_ref[n] = y2[n * S:n * S + H, :].astype(o_ref.dtype)


def _fold_bn_scale_shift(bias, gamma, beta, mean, var, eps=1e-5):
    scale = gamma / jnp.sqrt(var + eps)
    shift = (bias - mean) * scale + beta
    return scale, shift


def _banded_conv_weights(w_hwio, scale, W):
    """Fold the BN scale into the conv weights and build the kh-concatenated
    banded matrix Bcat of shape (3*W*Cin, W*Cout):
      Bcat[kh*W*Cin + w_in*Cin + c, w_out*Cout + co] = w[kh, kw, c, co]*scale[co]
    with kw = w_in - w_out + 1 (zero outside 0 <= kw <= 2).  Then
      y[m] = [xpad[m] | xpad[m+1] | xpad[m+2]] @ Bcat
    is exactly the 3x3 conv with padding=1 along W (the W zero-padding is
    absorbed into the band; the H padding is handled by the in-kernel scratch).
    """
    w = (w_hwio * scale[None, None, None, :]).astype(jnp.float32)  # exact f32 fold
    Cin, Cout = w.shape[2], w.shape[3]
    kw = jnp.arange(W)[:, None] - jnp.arange(W)[None, :] + 1       # (w_in, w_out)
    valid = ((kw >= 0) & (kw <= 2)).astype(jnp.float32)
    blocks = w[:, jnp.clip(kw, 0, 2)] * valid[None, :, :, None, None]  # (3,W,W,Cin,Cout)
    Bcat = blocks.transpose(0, 1, 3, 2, 4).reshape(3 * W * Cin, W * Cout)
    return Bcat.astype(jnp.bfloat16)


def prepare_conv_block_params(params, W, eps=1e-5):
    """One-time weight prep (hoisted out of the per-call forward path)."""
    Cout = params["w1"].shape[-1]
    s1, t1 = _fold_bn_scale_shift(params["b1"], params["gamma1"], params["beta1"],
                                  params["mean1"], params["var1"], eps)
    s2, t2 = _fold_bn_scale_shift(params["b2"], params["gamma2"], params["beta2"],
                                  params["mean2"], params["var2"], eps)
    return {
        "B1": _banded_conv_weights(params["w1"], s1, W),   # (3*W*Cin,  W*Cout) bf16
        "B2": _banded_conv_weights(params["w2"], s2, W),   # (3*W*Cout, W*Cout) bf16
        "sh1": jnp.tile(t1, W).reshape(1, W * Cout).astype(jnp.float32),
        "sh2": jnp.tile(t2, W).reshape(1, W * Cout).astype(jnp.float32),
    }


def _ceil_to(x, m):
    return (x + m - 1) // m * m


def conv_block_forward(x_nchw, prepared):
    """Full conv_block forward. Input/output are NCHW (PyTorch convention)."""
    N, Cin, H, W = x_nchw.shape
    wcin = W * Cin
    wcout = prepared["sh1"].shape[1]
    Cout = wcout // W
    assert prepared["B1"].shape == (3 * wcin, wcout)
    assert H % 2 == 0  # TODO(synk): odd H needs sub-word bf16 row stores

    # NCHW -> NHWC -> (N, H, W*Cin), bf16 for the HBM->VMEM DMA.
    x2d = jnp.transpose(x_nchw, (0, 2, 3, 1)).reshape(N, H, wcin)
    x2d = x2d.astype(jnp.bfloat16)

    slab = 16 + _ceil_to(H, 16)        # 16-row zero region + 16-row-aligned image
    pad_rows = N * slab + 16

    out2d = pl.pallas_call(
        _fused_conv_block_kernel,
        out_shape=jax.ShapeDtypeStruct((N, H, wcout), jnp.float32),
        grid_spec=pltpu.PrefetchScalarGridSpec(
            num_scalar_prefetch=0,
            grid=(1,),
            in_specs=[
                pl.BlockSpec((N, H, wcin), lambda i: (0, 0, 0)),
                pl.BlockSpec((3 * wcin, wcout), lambda i: (0, 0)),
                pl.BlockSpec((1, wcout), lambda i: (0, 0)),
                pl.BlockSpec((3 * wcout, wcout), lambda i: (0, 0)),
                pl.BlockSpec((1, wcout), lambda i: (0, 0)),
            ],
            out_specs=pl.BlockSpec((N, H, wcout), lambda i: (0, 0, 0)),
            scratch_shapes=[
                pltpu.VMEM((pad_rows, wcin), jnp.bfloat16),
                pltpu.VMEM((pad_rows, wcout), jnp.bfloat16),
            ],
        ),
        compiler_params=pltpu.CompilerParams(
            dimension_semantics=("arbitrary",),
            vmem_limit_bytes=32 * 1024 * 1024,   # safe on v5e/v6e/v7x
        ),
    )(x2d, prepared["B1"], prepared["sh1"], prepared["B2"], prepared["sh2"])

    out = out2d.reshape(N, H, W, Cout)
    return jnp.transpose(out, (0, 3, 1, 2))      # NHWC -> NCHW


def _reference_forward(x_nchw, params):
    """Plain-JAX reference (lax conv, f32) for correctness checking."""
    def layer(x, w_hwio, bias, gamma, beta, mean, var):
        y = jax.lax.conv_general_dilated(
            x, w_hwio, window_strides=(1, 1), padding=((1, 1), (1, 1)),
            dimension_numbers=("NCHW", "HWIO", "NCHW"),
        )
        y = y + bias[None, :, None, None]
        s = gamma / jnp.sqrt(var + 1e-5)
        y = (y - mean[None, :, None, None]) * s[None, :, None, None] \
            + beta[None, :, None, None]
        return jnp.maximum(y, 0.0)

    x = layer(x_nchw, params["w1"], params["b1"], params["gamma1"],
              params["beta1"], params["mean1"], params["var1"])
    x = layer(x, params["w2"], params["b2"], params["gamma2"],
              params["beta2"], params["mean2"], params["var2"])
    return x


def make_params(key, ch_in, ch_out):
    ks = jax.random.split(key, 12)
    return {
        # Conv weights stored as HWIO (3, 3, Cin, Cout).
        "w1": 0.1 * jax.random.normal(ks[0], (3, 3, ch_in, ch_out), jnp.float32),
        "b1": 0.05 * jax.random.normal(ks[1], (ch_out,), jnp.float32),
        "gamma1": 1.0 + 0.1 * jax.random.normal(ks[2], (ch_out,), jnp.float32),
        "beta1": 0.1 * jax.random.normal(ks[3], (ch_out,), jnp.float32),
        "mean1": 0.02 * jax.random.normal(ks[4], (ch_out,), jnp.float32),
        "var1": 1.0 + 0.1 * jnp.abs(jax.random.normal(ks[5], (ch_out,), jnp.float32)),
        "w2": 0.1 * jax.random.normal(ks[6], (3, 3, ch_out, ch_out), jnp.float32),
        "b2": 0.05 * jax.random.normal(ks[7], (ch_out,), jnp.float32),
        "gamma2": 1.0 + 0.1 * jax.random.normal(ks[8], (ch_out,), jnp.float32),
        "beta2": 0.1 * jax.random.normal(ks[9], (ch_out,), jnp.float32),
        "mean2": 0.02 * jax.random.normal(ks[10], (ch_out,), jnp.float32),
        "var2": 1.0 + 0.1 * jnp.abs(jax.random.normal(ks[11], (ch_out,), jnp.float32)),
    }


if __name__ == "__main__":
    key = jax.random.PRNGKey(0)
    k_x, k_p = jax.random.split(key)

    N, CH_IN, CH_OUT, H, W = 2, 4, 8, 16, 16
    x = jax.random.normal(k_x, (N, CH_IN, H, W), jnp.float32)   # NCHW input
    params = make_params(k_p, CH_IN, CH_OUT)

    # Weight prep (BN fold + banded/concatenated weights) is hoisted out of the
    # per-call path: run it once per parameter set.
    prepared = jax.block_until_ready(prepare_conv_block_params(params, W))

    fwd = jax.jit(conv_block_forward)
    out = jax.block_until_ready(fwd(x, prepared))

    ref = _reference_forward(x, params)
    assert out.shape == (N, CH_OUT, H, W)
    max_err = float(jnp.max(jnp.abs(out - ref)))
    # bf16 MXU inputs with f32 accumulation -> a few e-3 typical error.
    assert jnp.allclose(out, ref, atol=3e-2, rtol=3e-2), max_err

    print("KERNEL_OK")
</pallas_src>

<mosaic_0001>
module attributes {stable_mosaic.version = 11 : i64} {
  func.func @_fused_conv_block_kernel(%arg0: i32, %arg1: memref<2x16x64xbf16, #tpu.memory_space<vmem>>, %arg2: memref<192x128xbf16, #tpu.memory_space<vmem>>, %arg3: memref<1x128xf32, #tpu.memory_space<vmem>>, %arg4: memref<384x128xbf16, #tpu.memory_space<vmem>>, %arg5: memref<1x128xf32, #tpu.memory_space<vmem>>, %arg6: memref<2x16x128xf32, #tpu.memory_space<vmem>>, %arg7: memref<80x64xbf16, #tpu.memory_space<vmem>>, %arg8: memref<80x128xbf16, #tpu.memory_space<vmem>>) attributes {dimension_semantics = [#tpu.dimension_semantics<arbitrary>], iteration_bounds = array<i64: 1>, scalar_prefetch = 0 : i64, scratch_operands = 2 : i64, tpu.core_type = #tpu.core_type<tc>, window_params = [{pipeline_mode = #tpu.pipeline_mode<synchronous>, transform_indices = @transform_0, window_bounds = array<i64: 2, 16, 64>}, {pipeline_mode = #tpu.pipeline_mode<synchronous>, transform_indices = @transform_1, window_bounds = array<i64: 192, 128>}, {pipeline_mode = #tpu.pipeline_mode<synchronous>, transform_indices = @transform_2, window_bounds = array<i64: 1, 128>}, {pipeline_mode = #tpu.pipeline_mode<synchronous>, transform_indices = @transform_3, window_bounds = array<i64: 384, 128>}, {pipeline_mode = #tpu.pipeline_mode<synchronous>, transform_indices = @transform_4, window_bounds = array<i64: 1, 128>}, {pipeline_mode = #tpu.pipeline_mode<synchronous>, transform_indices = @transform_5, window_bounds = array<i64: 2, 16, 128>}]} {
    %cst = arith.constant 0.000000e+00 : bf16
    %0 = vector.broadcast %cst : bf16 to vector<16x64xbf16>
    %c0 = arith.constant 0 : index
    %c0_0 = arith.constant 0 : index
    %1 = vector.load %arg7[%c0, %c0_0] : memref<80x64xbf16, #tpu.memory_space<vmem>>, vector<16x64xbf16>
    tpu.vector_store %arg7[%c0, %c0_0], %0 {strides = array<i32>} : memref<80x64xbf16, #tpu.memory_space<vmem>>, vector<16x64xbf16>,
    %cst_1 = arith.constant 0.000000e+00 : bf16
    %2 = vector.broadcast %cst_1 : bf16 to vector<16x128xbf16>
    %c0_2 = arith.constant 0 : index
    %c0_3 = arith.constant 0 : index
    %3 = vector.load %arg8[%c0_2, %c0_3] : memref<80x128xbf16, #tpu.memory_space<vmem>>, vector<16x128xbf16>
    tpu.vector_store %arg8[%c0_2, %c0_3], %2 {strides = array<i32>} : memref<80x128xbf16, #tpu.memory_space<vmem>>, vector<16x128xbf16>,
    %cst_4 = arith.constant 0.000000e+00 : bf16
    %4 = vector.broadcast %cst_4 : bf16 to vector<16x64xbf16>
    %c32 = arith.constant 32 : index
    %c0_5 = arith.constant 0 : index
    %5 = vector.load %arg7[%c32, %c0_5] : memref<80x64xbf16, #tpu.memory_space<vmem>>, vector<16x64xbf16>
    tpu.vector_store %arg7[%c32, %c0_5], %4 {strides = array<i32>} : memref<80x64xbf16, #tpu.memory_space<vmem>>, vector<16x64xbf16>,
    %cst_6 = arith.constant 0.000000e+00 : bf16
    %6 = vector.broadcast %cst_6 : bf16 to vector<16x128xbf16>
    %c32_7 = arith.constant 32 : index
    %c0_8 = arith.constant 0 : index
    %7 = vector.load %arg8[%c32_7, %c0_8] : memref<80x128xbf16, #tpu.memory_space<vmem>>, vector<16x128xbf16>
    tpu.vector_store %arg8[%c32_7, %c0_8], %6 {strides = array<i32>} : memref<80x128xbf16, #tpu.memory_space<vmem>>, vector<16x128xbf16>,
    %c0_9 = arith.constant 0 : index
    %c0_10 = arith.constant 0 : index
    %c0_11 = arith.constant 0 : index
    %8 = vector.load %arg1[%c0_9, %c0_10, %c0_11] : memref<2x16x64xbf16, #tpu.memory_space<vmem>>, vector<1x16x64xbf16>
    %9 = vector.shape_cast %8 : vector<1x16x64xbf16> to vector<16x64xbf16>
    %c16 = arith.constant 16 : index
    %c0_12 = arith.constant 0 : index
    %10 = vector.load %arg7[%c16, %c0_12] : memref<80x64xbf16, #tpu.memory_space<vmem>>, vector<16x64xbf16>
    tpu.vector_store %arg7[%c16, %c0_12], %9 {strides = array<i32>} : memref<80x64xbf16, #tpu.memory_space<vmem>>, vector<16x64xbf16>,
    %cst_13 = arith.constant 0.000000e+00 : bf16
    %11 = vector.broadcast %cst_13 : bf16 to vector<16x64xbf16>
    %c64 = arith.constant 64 : index
    %c0_14 = arith.constant 0 : index
    %12 = vector.load %arg7[%c64, %c0_14] : memref<80x64xbf16, #tpu.memory_space<vmem>>, vector<16x64xbf16>
    tpu.vector_store %arg7[%c64, %c0_14], %11 {strides = array<i32>} : memref<80x64xbf16, #tpu.memory_space<vmem>>, vector<16x64xbf16>,
    %cst_15 = arith.constant 0.000000e+00 : bf16
    %13 = vector.broadcast %cst_15 : bf16 to vector<16x128xbf16>
    %c64_16 = arith.constant 64 : index
    %c0_17 = arith.constant 0 : index
    %14 = vector.load %arg8[%c64_16, %c0_17] : memref<80x128xbf16, #tpu.memory_space<vmem>>, vector<16x128xbf16>
    tpu.vector_store %arg8[%c64_16, %c0_17], %13 {strides = array<i32>} : memref<80x128xbf16, #tpu.memory_space<vmem>>, vector<16x128xbf16>,
    %c1 = arith.constant 1 : index
    %c0_18 = arith.constant 0 : index
    %c0_19 = arith.constant 0 : index
    %15 = vector.load %arg1[%c1, %c0_18, %c0_19] : memref<2x16x64xbf16, #tpu.memory_space<vmem>>, vector<1x16x64xbf16>
    %16 = vector.shape_cast %15 : vector<1x16x64xbf16> to vector<16x64xbf16>
    %c48 = arith.constant 48 : index
    %c0_20 = arith.constant 0 : index
    %17 = vector.load %arg7[%c48, %c0_20] : memref<80x64xbf16, #tpu.memory_space<vmem>>, vector<16x64xbf16>
    tpu.vector_store %arg7[%c48, %c0_20], %16 {strides = array<i32>} : memref<80x64xbf16, #tpu.memory_space<vmem>>, vector<16x64xbf16>,
    %c15 = arith.constant 15 : index
    %c0_21 = arith.constant 0 : index
    %18 = vector.load %arg7[%c15, %c0_21] : memref<80x64xbf16, #tpu.memory_space<vmem>>, vector<48x64xbf16>
    %c16_22 = arith.constant 16 : index
    %c0_23 = arith.constant 0 : index
    %19 = vector.load %arg7[%c16_22, %c0_23] : memref<80x64xbf16, #tpu.memory_space<vmem>>, vector<48x64xbf16>
    %c17 = arith.constant 17 : index
    %c0_24 = arith.constant 0 : index
    %20 = vector.load %arg7[%c17, %c0_24] : memref<80x64xbf16, #tpu.memory_space<vmem>>, vector<48x64xbf16>
    %21 = tpu.concatenate %18, %19, %20 in 1 : vector<48x64xbf16>, vector<48x64xbf16>, vector<48x64xbf16> -> vector<48x192xbf16>
    %c0_25 = arith.constant 0 : index
    %c0_26 = arith.constant 0 : index
    %22 = vector.load %arg2[%c0_25, %c0_26] : memref<192x128xbf16, #tpu.memory_space<vmem>>, vector<192x128xbf16>
    %cst_27 = arith.constant dense<0.000000e+00> : vector<48x128xf32>
    %23 = tpu.matmul %21, %22, %cst_27 {dimension_numbers = #tpu.dot_dimension_numbers<[1], [0], [0], [1], [0, 0, 1, 1], [], []>} : vector<48x192xbf16>, vector<192x128xbf16>, vector<48x128xf32> -> vector<48x128xf32>
    %c0_28 = arith.constant 0 : index
    %c0_29 = arith.constant 0 : index
    %24 = vector.load %arg3[%c0_28, %c0_29] : memref<1x128xf32, #tpu.memory_space<vmem>>, vector<1x128xf32>
    %25 = vector.broadcast %24 : vector<1x128xf32> to vector<48x128xf32>
    %26 = arith.addf %23, %25 : vector<48x128xf32>
    %cst_30 = arith.constant 0.000000e+00 : f32
    %27 = vector.broadcast %cst_30 : f32 to vector<48x128xf32>
    %28 = arith.maximumf %26, %27 : vector<48x128xf32>
    %29 = arith.truncf %28 : vector<48x128xf32> to vector<48x128xbf16>
    %30 = vector.extract_strided_slice %29 {offsets = [0, 0], sizes = [16, 128], strides = [1, 1]} : vector<48x128xbf16> to vector<16x128xbf16>
    %c16_31 = arith.constant 16 : index
    %c0_32 = arith.constant 0 : index
    %31 = vector.load %arg8[%c16_31, %c0_32] : memref<80x128xbf16, #tpu.memory_space<vmem>>, vector<16x128xbf16>
    tpu.vector_store %arg8[%c16_31, %c0_32], %30 {strides = array<i32>} : memref<80x128xbf16, #tpu.memory_space<vmem>>, vector<16x128xbf16>,
    %32 = vector.extract_strided_slice %29 {offsets = [32, 0], sizes = [16, 128], strides = [1, 1]} : vector<48x128xbf16> to vector<16x128xbf16>
    %c48_33 = arith.constant 48 : index
    %c0_34 = arith.constant 0 : index
    %33 = vector.load %arg8[%c48_33, %c0_34] : memref<80x128xbf16, #tpu.memory_space<vmem>>, vector<16x128xbf16>
    tpu.vector_store %arg8[%c48_33, %c0_34], %32 {strides = array<i32>} : memref<80x128xbf16, #tpu.memory_space<vmem>>, vector<16x128xbf16>,
    %c15_35 = arith.constant 15 : index
    %c0_36 = arith.constant 0 : index
    %34 = vector.load %arg8[%c15_35, %c0_36] : memref<80x128xbf16, #tpu.memory_space<vmem>>, vector<48x128xbf16>
    %c16_37 = arith.constant 16 : index
    %c0_38 = arith.constant 0 : index
    %35 = vector.load %arg8[%c16_37, %c0_38] : memref<80x128xbf16, #tpu.memory_space<vmem>>, vector<48x128xbf16>
    %c17_39 = arith.constant 17 : index
    %c0_40 = arith.constant 0 : index
    %36 = vector.load %arg8[%c17_39, %c0_40] : memref<80x128xbf16, #tpu.memory_space<vmem>>, vector<48x128xbf16>
    %37 = tpu.concatenate %34, %35, %36 in 1 : vector<48x128xbf16>, vector<48x128xbf16>, vector<48x128xbf16> -> vector<48x384xbf16>
    %c0_41 = arith.constant 0 : index
    %c0_42 = arith.constant 0 : index
    %38 = vector.load %arg4[%c0_41, %c0_42] : memref<384x128xbf16, #tpu.memory_space<vmem>>, vector<384x128xbf16>
    %cst_43 = arith.constant dense<0.000000e+00> : vector<48x128xf32>
    %39 = tpu.matmul %37, %38, %cst_43 {dimension_numbers = #tpu.dot_dimension_numbers<[1], [0], [0], [1], [0, 0, 1, 1], [], []>} : vector<48x384xbf16>, vector<384x128xbf16>, vector<48x128xf32> -> vector<48x128xf32>
    %c0_44 = arith.constant 0 : index
    %c0_45 = arith.constant 0 : index
    %40 = vector.load %arg5[%c0_44, %c0_45] : memref<1x128xf32, #tpu.memory_space<vmem>>, vector<1x128xf32>
    %41 = vector.broadcast %40 : vector<1x128xf32> to vector<48x128xf32>
    %42 = arith.addf %39, %41 : vector<48x128xf32>
    %cst_46 = arith.constant 0.000000e+00 : f32
    %43 = vector.broadcast %cst_46 : f32 to vector<48x128xf32>
    %44 = arith.maximumf %42, %43 : vector<48x128xf32>
    %45 = vector.extract_strided_slice %44 {offsets = [0, 0], sizes = [16, 128], strides = [1, 1]} : vector<48x128xf32> to vector<16x128xf32>
    %c0_47 = arith.constant 0 : index
    %c0_48 = arith.constant 0 : index
    %c0_49 = arith.constant 0 : index
    %46 = vector.load %arg6[%c0_47, %c0_48, %c0_49] : memref<2x16x128xf32, #tpu.memory_space<vmem>>, vector<1x16x128xf32>
    %47 = vector.shape_cast %46 : vector<1x16x128xf32> to vector<16x128xf32>
    %48 = vector.shape_cast %45 : vector<16x128xf32> to vector<1x16x128xf32>
    tpu.vector_store %arg6[%c0_47, %c0_48, %c0_49], %48 {strides = array<i32>} : memref<2x16x128xf32, #tpu.memory_space<vmem>>, vector<1x16x128xf32>,
    %49 = vector.extract_strided_slice %44 {offsets = [32, 0], sizes = [16, 128], strides = [1, 1]} : vector<48x128xf32> to vector<16x128xf32>
    %c1_50 = arith.constant 1 : index
    %c0_51 = arith.constant 0 : index
    %c0_52 = arith.constant 0 : index
    %50 = vector.load %arg6[%c1_50, %c0_51, %c0_52] : memref<2x16x128xf32, #tpu.memory_space<vmem>>, vector<1x16x128xf32>
    %51 = vector.shape_cast %50 : vector<1x16x128xf32> to vector<16x128xf32>
    %52 = vector.shape_cast %49 : vector<16x128xf32> to vector<1x16x128xf32>
    tpu.vector_store %arg6[%c1_50, %c0_51, %c0_52], %52 {strides = array<i32>} : memref<2x16x128xf32, #tpu.memory_space<vmem>>, vector<1x16x128xf32>,
    return
  }
  func.func @transform_0(%arg0: i32) -> (i32, i32, i32) {
    %c0_i32 = arith.constant 0 : i32
    %c0_i32_0 = arith.constant 0 : i32
    %c0_i32_1 = arith.constant 0 : i32
    %c0_i32_2 = arith.constant 0 : i32
    return %c0_i32, %c0_i32_0, %c0_i32_1 : i32, i32, i32
  }
  func.func @transform_1(%arg0: i32) -> (i32, i32) {
    %c0_i32 = arith.constant 0 : i32
    %c0_i32_0 = arith.constant 0 : i32
    %c0_i32_1 = arith.constant 0 : i32
    return %c0_i32, %c0_i32_0 : i32, i32
  }
  func.func @transform_2(%arg0: i32) -> (i32, i32) {
    %c0_i32 = arith.constant 0 : i32
    %c0_i32_0 = arith.constant 0 : i32
    %c0_i32_1 = arith.constant 0 : i32
    return %c0_i32, %c0_i32_0 : i32, i32
  }
  func.func @transform_3(%arg0: i32) -> (i32, i32) {
    %c0_i32 = arith.constant 0 : i32
    %c0_i32_0 = arith.constant 0 : i32
    %c0_i32_1 = arith.constant 0 : i32
    return %c0_i32, %c0_i32_0 : i32, i32
  }
  func.func @transform_4(%arg0: i32) -> (i32, i32) {
    %c0_i32 = arith.constant 0 : i32
    %c0_i32_0 = arith.constant 0 : i32
    %c0_i32_1 = arith.constant 0 : i32
    return %c0_i32, %c0_i32_0 : i32, i32
  }
  func.func @transform_5(%arg0: i32) -> (i32, i32, i32) {
    %c0_i32 = arith.constant 0 : i32
    %c0_i32_0 = arith.constant 0 : i32
    %c0_i32_1 = arith.constant 0 : i32
    %c0_i32_2 = arith.constant 0 : i32
    return %c0_i32, %c0_i32_0, %c0_i32_1 : i32, i32, i32
  }
}

</mosaic_0001>

<bundles_post_ra>
// kernel: conv_block_forward.1
= control target key start
LH: loop header
LB: loop body
LE: loop exit
PB: predicated region body
PF: predicated region fallthrough
CT: control target
= control target key end

     0   :  { %vm21_vm0 = vcmask 519168   ;;  %v1095_v3 = vmov 0   ;;  %s1096_s8 = smov 64   ;;  %vm72_vm1 = vsmask.f32 3328  ;;  %vm110_vm2 = vcmask 1042432   ;;  %s1329_s0 = inlined_call_operand.vmem [shape: bf16[2,16,64], index: 0, kind: input, shape index: {}]   ;;  %s1330_s1 = inlined_call_operand.vmem [shape: bf16[192,128], index: 1, kind: input, shape index: {}]   ;;  %s1331_s2 = inlined_call_operand.vmem [shape: f32[1,128], index: 2, kind: input, shape index: {}]   ;;  %s1332_s3 = inlined_call_operand.vmem [shape: bf16[384,128], index: 3, kind: input, shape index: {}]   ;;  %s1333_s4 = inlined_call_operand.vmem [shape: f32[1,128], index: 4, kind: input, shape index: {}]   ;;  %s1334_s5 = inlined_call_operand.vmem [shape: f32[2,16,128], index: 5, kind: output, shape index: {}]  }
   0x1   :  { %v30_v0 = vld [vmem:[%s1329_s0] sm:$0xf]  ;;  %v31_v1 = vld [vmem:[%s1329_s0 + $0x4] sm:$0xf]  ;;  %v978_v2 = vld [vmem:[%s1330_s1 + $0x38] sm:$0xff]  ;;  %vm118_vm3 = vcmask 523264  }
   0x2   :  { %32 = vst.msk [vmem:[#allocation2 + $0x8] sm:$0xf] %vm21_vm0, %v30_v0  ;;  %310 = vmatpush.bf16.msra.mxu0 %v978_v2  ;;  %v977_v4 = vld [vmem:[%s1330_s1 + $0x30] sm:$0xff]  ;;  %v820_v5 = vld [vmem:[%s1329_s0 + $0x8] sm:$0xf]  ;;  %v975_v14 = vld [vmem:[%s1330_s1 + $0x20] sm:$0xff] }
   0x3   :  { %33 = vst.msk [vmem:[#allocation2 + $0xc] sm:$0xf] %vm21_vm0, %v31_v1  ;;  %v821_v6 = vld [vmem:[%s1329_s0 + $0xc] sm:$0xf]  ;;  %v974_v29 = vld [vmem:[%s1330_s1 + $0x18] sm:$0xff]  ;;  %v973_v30 = vld [vmem:[%s1330_s1 + $0x10] sm:$0xff] }
   0x4   :  { %26 = vst.msk [vmem:[#allocation2 + $0x10] sm:$0xf] %vm21_vm0, %v1095_v3  ;;  %v976_v7 = vld [vmem:[%s1330_s1 + $0x28] sm:$0xff]  ;;  %v971_v32 = vld [vmem:[%s1330_s1] sm:$0xff]  ;;  %v982_v33 = vld [vmem:[%s1330_s1 + $0x58] sm:$0xff] }
   0x5   :  { %27 = vst.msk [vmem:[#allocation2 + $0x14] sm:$0xf] %vm21_vm0, %v1095_v3  ;;  %v972_v31 = vld [vmem:[%s1330_s1 + $0x8] sm:$0xff]  ;;  %1077 = vmatpush.bf16.msra.mxu1 %v982_v33  ;;  %v981_v34 = vld [vmem:[%s1330_s1 + $0x50] sm:$0xff]  ;;  %v979_v40 = vld [vmem:[%s1330_s1 + $0x40] sm:$0xff] }
   0x6   :  { %41 = vst.msk [vmem:[#allocation2 + $0x18] sm:$0xf] %vm21_vm0, %v820_v5  ;;  %311 = vmatpush.bf16.msra.mxu0 %v977_v4  ;;  %v980_v37 = vld [vmem:[%s1330_s1 + $0x48] sm:$0xff]  ;;  %vm159_vm4 = vsmask.f32 4352 }
   0x7   :  { %42 = vst.msk [vmem:[#allocation2 + $0x1c] sm:$0xf] %vm21_vm0, %v821_v6 }
   0x8   :  { %23 = vst.msk [vmem:[#allocation2 + $0x4] sm:$0xf] %vm21_vm0, %v1095_v3 }
   0x9   :  { %25 = vst [vmem:[#allocation3 + $0x4] sm:$0xf] %v1095_v3  ;;  %1078 = vmatpush.bf16.msra.mxu1 %v981_v34  ;;  %v1082_v39 = vld [vmem:[#allocation2 + $0x4] sm:$0xf0]  }
   0xa   :  { %v1041_v8 = vld [vmem:[#allocation2 + $0x8] sm:$0xff]   ;;  %28 = vst [vmem:[#allocation3 + $0x10] sm:$0xf] %v1095_v3  ;;  %312 = vmatpush.bf16.msra.mxu0 %v976_v7 }
   0xb   :  { %v74_v9 = vshrl.u32 %v1041_v8, 16  ;;  %v77_v10 = vshll.u32 %v1041_v8, 16  ;;  %29 = vst [vmem:[#allocation3 + $0x14] sm:$0xf] %v1095_v3  ;;  %v1183_v35 = vrot.slane %v1041_v8, 5  ;;  %v1084_v59 = vld [vmem:[#allocation2 + $0xc] sm:$0xff]  }
   0xc   :  { %v1042_v13 = vld [vmem:[#allocation2 + $0x10] sm:$0xff]   ;;  %34 = vst.msk [vmem:[#allocation2 + $0x20] sm:$0xf] %vm21_vm0, %v1095_v3 }
   0xd   :  { %v76_v11 = vrot.slane %v74_v9, 4  ;;  %v79_v12 = vrot.slane %v77_v10, 5  ;;  %v82_v15 = vshrl.u32 %v1042_v13, 16  ;;  %v85_v16 = vshll.u32 %v1042_v13, 16  ;;  %36 = vst [vmem:[#allocation3 + $0x20] sm:$0xf] %v1095_v3  ;;  %1079 = vmatpush.bf16.msra.mxu1 %v980_v37 }
   0xe   :  { %v1159_v20 = vld [vmem:[#allocation2 + $0x18] sm:$0xff]   ;;  %313 = vmatpush.bf16.msra.mxu0 %v975_v14  ;;  %v112_v36 = vrot.slane %v1042_v13, 5 }
   0xf   :  { %v80_v17 = vor.u32 %v79_v12, %v76_v11  ;;  %v84_v18 = vrot.slane %v82_v15, 4  ;;  %v87_v19 = vrot.slane %v85_v16, 5  ;;  %v91_v22 = vshrl.u32 %v1159_v20, 16  ;;  %v1051_v43 = vld [vmem:[#allocation2 + $0x4] sm:$0x8]  ;;  %v1085_v10 = vld [vmem:[#allocation2 + $0x14] sm:$0xff]  }
  0x10   :  { %v94_v23 = vshll.u32 %v1159_v20, 16  ;;  %v114_v38 = vrot.slane %v1159_v20, 5  ;;  %v113_v41 = vsel %vm110_vm2, %v1183_v35, %v112_v36  ;;  %v1052_v52 = vor.u32 %v1082_v39, %v1051_v43 }
  0x11   :  { %99 = vrot.lane.b32.xlu0 %v80_v17, %s1096_s8  ;;  %v88_v21 = vor.u32 %v87_v19, %v84_v18  ;;  %v93_v24 = vrot.slane %v91_v22, 4  ;;  %v184_v44 = vshrl.u32 %v113_v41, 16  ;;  %v187_v45 = vshll.u32 %v113_v41, 16  ;;  %1080 = vmatpush.bf16.msra.mxu1 %v979_v40 }
  0x12   :  { %v96_v25 = vrot.slane %v94_v23, 5  ;;  %314 = vmatpush.bf16.msra.mxu0 %v974_v29  ;;  %v115_v42 = vsel %vm110_vm2, %v112_v36, %v114_v38  ;;  %v176_v22 = vshrl.u32 %v1183_v35, 16  ;;  %v179_v23 = vshll.u32 %v1183_v35, 16 }
  0x13   :  { %v89_v27 = vsel %vm72_vm1, %v80_v17, %v88_v21  ;;  %v201_v46 = vshrl.u32 %v115_v42, 16  ;;  %v204_v47 = vshll.u32 %v115_v42, 16  ;;  %v186_v48 = vrot.slane %v184_v44, 3  ;;  %v50_v58 = vld [vmem:[#allocation2 + $0x20] sm:$0x1] }
  0x14   :  { %v97_v26 = vor.u32 %v96_v25, %v93_v24  ;;  %v189_v49 = vrot.slane %v187_v45, 4  ;;  %v108_v60 = vunpack.c.l.b16 %v50_v58  ;;  %v178_v25 = vrot.slane %v176_v22, 3  ;;  %v988_v58 = vld [vmem:[%s1332_s3 + $0x28] sm:$0xff] }
  0x15   :  { %v203_v50 = vrot.slane %v201_v46, 3  ;;  %v206_v51 = vrot.slane %v204_v47, 4 }
  0x16   :  { %v98_v28 = vsel %vm72_vm1, %v88_v21, %v97_v26  ;;  %315 = vmatpush.bf16.msra.mxu0 %v973_v30  ;;  %v190_v54 = vor.u32 %v189_v49, %v186_v48  ;;  %v109_v63 = vpack.c.b16 %v108_v60, %v108_v60  ;;  %v1006_v48 = vld [vmem:[%s1332_s3 + $0xb8] sm:$0xff]  ;;  %v995_v60 = vld [vmem:[%s1332_s3 + $0x60] sm:$0xff] }
  0x17   :  { %103 = vrot.lane.b32.xlu1 %v98_v28, %s1096_s8  ;;  %v207_v55 = vor.u32 %v206_v51, %v203_v50  ;;  %785 = vmatpush.bf16.msrb.mxu1 %v1006_v48  ;;  %v998_v49 = vld [vmem:[%s1332_s3 + $0x78] sm:$0xff]  ;;  %v1005_v50 = vld [vmem:[%s1332_s3 + $0xb0] sm:$0xff] }
  0x18   :  { %v116_v2 = vrot.slane %v109_v63, 5  ;;  %763 = vmatpush.bf16.msra.mxu3 %v998_v49  ;;  %v990_v51 = vld [vmem:[%s1332_s3 + $0x38] sm:$0xff] }
  0x19   :  { %101 = vrot.lane.b32.xlu0 %v89_v27, %s1096_s8  ;;  %v208_v56 = vsel %vm159_vm4, %v190_v54, %v207_v55  ;;  %741 = vmatpush.bf16.msra.mxu2 %v990_v51  ;;  %v994_v63 = vld [vmem:[%s1332_s3 + $0x58] sm:$0xff]  ;;  %v1065_v51 = vld [vmem:[#allocation3 + $0x4] sm:$0x8] }
  0x1a   :  { %316 = vmatpush.bf16.msra.mxu0 %v972_v31  ;;  %871 = vmatmul.msk.bf16.vlgmr.msra.gmra.mxu1 %vm118_vm3, %v208_v56  ;;  %v117_v7 = vsel %vm110_vm2, %v114_v38, %v116_v2  ;;  %v996_v56 = vld [vmem:[%s1332_s3 + $0x68] sm:$0xff]  ;;  %v986_v2 = vld [vmem:[%s1332_s3 + $0x18] sm:$0xff] }
  0x1b   :  { %v218_v11 = vshrl.u32 %v117_v7, 16  ;;  %v221_v12 = vshll.u32 %v117_v7, 16  ;;  %786 = vmatpush.bf16.msrb.mxu1 %v1005_v50  ;;  %v992_v7 = vld [vmem:[%s1332_s3 + $0x48] sm:$0xff] }
  0x1d   :  { %v220_v16 = vrot.slane %v218_v11, 3  ;;  %v223_v17 = vrot.slane %v221_v12, 4  ;;  %v984_v11 = vld [vmem:[%s1332_s3 + $0x8] sm:$0xff] }
  0x1e   :  { %317 = vmatpush.bf16.msra.mxu0 %v971_v32 }
  0x1f   :  { %105 = vrot.lane.b32.xlu1 %v97_v26, %s1096_s8  ;;  %v224_v21 = vor.u32 %v223_v17, %v220_v16  ;;  %v181_v26 = vrot.slane %v179_v23, 4  ;;  %v983_v17 = vld [vmem:[%s1332_s3] sm:$0xff] }
  0x21   :  { %v225_v24 = vsel %vm159_vm4, %v207_v55, %v224_v21  ;;  %v182_v29 = vor.u32 %v181_v26, %v178_v25  ;;  %v989_v55 = vld [vmem:[%s1332_s3 + $0x30] sm:$0xff] }
  0x22   :  { %336 = vmatpush.bf16.msrb.mxu0 %v982_v33  ;;  %v1018_v33 = vunpack.c.h.b16 %v1159_v20  ;;  %742 = vmatpush.bf16.msra.mxu2 %v989_v55 }
  0x23   :  { %v191_v30 = vsel %vm159_vm4, %v182_v29, %v190_v54  ;;  %v1004_v54 = vld [vmem:[%s1332_s3 + $0xa8] sm:$0xff]  ;;  %v1047_v29 = vld [vmem:[#allocation3 + $0x10] sm:$0xff]  }
  0x24   :  { %v68_v36 = vpack.c.b16 %v1018_v33, %v1018_v33  ;;  %787 = vmatpush.bf16.msrb.mxu1 %v1004_v54  ;;  %v407_v33 = vshll.u32 %v1047_v29, 16 }
  0x26   :  { %337 = vmatpush.bf16.msrb.mxu0 %v981_v34  ;;  %743 = vmatpush.bf16.msra.mxu2 %v988_v58 }
  0x2a   :  { %338 = vmatpush.bf16.msrb.mxu0 %v980_v37  ;;  %872 = vmatmul.msk.bf16.gmra.mxu1 %vm118_vm3, %v225_v24 }
  0x2e   :  { %339 = vmatpush.bf16.msrb.mxu0 %v979_v40 }
  0x83   :  { %v100_v53 = vpop.permute.xlu0 %99 }
  0x84   :  { %v121_v57 = vsel %vm118_vm3, %v1052_v52, %v100_v53  ;;  %v997_v53 = vld [vmem:[%s1332_s3 + $0x70] sm:$0xff] }
  0x85   :  { %v160_v61 = vshrl.u32 %v121_v57, 16  ;;  %v163_v62 = vshll.u32 %v121_v57, 16  ;;  %764 = vmatpush.bf16.msra.mxu3 %v997_v53  ;;  %v1003_v57 = vld [vmem:[%s1332_s3 + $0xa0] sm:$0xff] }
  0x86   :  { %788 = vmatpush.bf16.msrb.mxu1 %v1003_v57 }
  0x87   :  { %v162_v3 = vrot.slane %v160_v61, 3  ;;  %v165_v4 = vrot.slane %v163_v62, 4  ;;  %v1002_v61 = vld [vmem:[%s1332_s3 + $0x98] sm:$0xff]  ;;  %v987_v62 = vld [vmem:[%s1332_s3 + $0x20] sm:$0xff] }
  0x88   :  { %744 = vmatpush.bf16.msra.mxu2 %v987_v62 }
  0x89   :  { %v104_v13 = vpop.permute.xlu1 %103  ;;  %v166_v14 = vor.u32 %v165_v4, %v162_v3  ;;  %765 = vmatpush.bf16.msra.mxu3 %v996_v56  ;;  %v993_v4 = vld [vmem:[%s1332_s3 + $0x50] sm:$0xff] }
  0x8a   :  { %v127_v19 = vsel %vm118_vm3, %v1085_v10, %v104_v13  ;;  %789 = vmatpush.bf16.msrb.mxu1 %v1002_v61 }
  0x8b   :  { %v102_v0 = vpop.permute.xlu0 %101  ;;  %v192_v27 = vshrl.u32 %v127_v19, 16  ;;  %v195_v28 = vshll.u32 %v127_v19, 16 }
  0x8c   :  { %v124_v1 = vsel %vm118_vm3, %v1084_v59, %v102_v0  ;;  %v1001_v0 = vld [vmem:[%s1332_s3 + $0x90] sm:$0xff]  ;;  %745 = vmatpush.bf16.msra.mxu2 %v986_v2 }
  0x8d   :  { %v167_v5 = vshrl.u32 %v124_v1, 16  ;;  %v170_v6 = vshll.u32 %v124_v1, 16  ;;  %v194_v31 = vrot.slane %v192_v27, 3  ;;  %v197_v32 = vrot.slane %v195_v28, 4  ;;  %766 = vmatpush.bf16.msra.mxu3 %v995_v60 }
  0x8e   :  { %790 = vmatpush.bf16.msrb.mxu1 %v1001_v0 }
  0x8f   :  { %v169_v8 = vrot.slane %v167_v5, 3  ;;  %v172_v9 = vrot.slane %v170_v6, 4  ;;  %v198_v34 = vor.u32 %v197_v32, %v194_v31  ;;  %v1000_v5 = vld [vmem:[%s1332_s3 + $0x88] sm:$0xff]  ;;  %v985_v6 = vld [vmem:[%s1332_s3 + $0x10] sm:$0xff]  ;;  %v404_v32 = vshrl.u32 %v1047_v29, 16 }
  0x90   :  { %746 = vmatpush.bf16.msra.mxu2 %v985_v6 }
  0x91   :  { %v173_v15 = vor.u32 %v172_v9, %v169_v8  ;;  %v106_v37 = vpop.permute.xlu1 %105  ;;  %767 = vmatpush.bf16.msra.mxu3 %v994_v63  ;;  %v999_v8 = vld [vmem:[%s1332_s3 + $0x80] sm:$0xff] }
  0x92   :  { %v130_v38 = vsel %vm118_vm3, %v68_v36, %v106_v37  ;;  %791 = vmatpush.bf16.msrb.mxu1 %v1000_v5  ;;  %v1093_v9 = vld [vmem:[%s1331_s2] ss:$0 sm:$0xff]  ;;  %v425_v37 = vrot.slane %v1047_v29, 5 }
  0x93   :  { %v174_v18 = vsel %vm159_vm4, %v166_v14, %v173_v15  ;;  %v199_v35 = vsel %vm159_vm4, %v173_v15, %v198_v34  ;;  %v209_v39 = vshrl.u32 %v130_v38, 16  ;;  %v212_v40 = vshll.u32 %v130_v38, 16  ;;  %v991_v14 = vld [vmem:[%s1332_s3 + $0x40] sm:$0xff] }
  0x94   :  { %318 = vmatmul.bf16.vlgmr.msra.gmra.mxu0 %v174_v18  ;;  %747 = vmatpush.bf16.msra.mxu2 %v984_v11 }
  0x95   :  { %v211_v41 = vrot.slane %v209_v39, 3  ;;  %v214_v42 = vrot.slane %v212_v40, 4  ;;  %768 = vmatpush.bf16.msra.mxu3 %v993_v4  ;;  %v406_v39 = vrot.slane %v404_v32, 4  ;;  %v409_v40 = vrot.slane %v407_v33, 5 }
  0x96   :  { %792 = vmatpush.bf16.msrb.mxu1 %v999_v8 }
  0x97   :  { %v215_v43 = vor.u32 %v214_v42, %v211_v41  ;;  %v346_v45 = vpop.f32.mrf.mxu1  ;;  %v410_v55 = vor.u32 %v409_v40, %v406_v39 }
  0x98   :  { %748 = vmatpush.bf16.msra.mxu2 %v983_v17 }
  0x99   :  { %v216_v44 = vsel %vm159_vm4, %v198_v34, %v215_v43  ;;  %769 = vmatpush.bf16.msra.mxu3 %v992_v7 }
  0x9d   :  { %770 = vmatpush.bf16.msra.mxu3 %v991_v14 }
  0x9f   :  { %v347_v20 = vpop.f32.mrf.mxu1 }
  0xa4   :  { %323 = vmatmul.bf16.gmra.mxu0 %v199_v35 }
  0xa7   :  { %v349_v1 = vpop.f32.mrf.mxu1 }
  0xaf   :  { %v351_v13 = vpop.f32.mrf.mxu1 }
  0xb4   :  { %326 = vmatmul.bf16.gmra.mxu0 %v216_v44 }
  0xc4   :  { %870 = vmatmul.msk.bf16.vlgmr.msrb.gmra.mxu0 %vm118_vm3, %v191_v30 }
 0x111   :  { %v1212_v46 = vpop.f32.mrf.mxu0 }
 0x112   :  { %v320_v24 = vadd.f32 %v1093_v9, %v1212_v46 }
 0x119   :  { %v1214_v47 = vpop.f32.mrf.mxu0 }
 0x11a   :  { %v322_v25 = vadd.f32 %v1093_v9, %v1214_v47 }
 0x121   :  { %v324_v52 = vpop.f32.mrf.mxu0 }
 0x129   :  { %v325_v59 = vpop.f32.mrf.mxu0 }
 0x131   :  { %v327_v3 = vpop.f32.mrf.mxu0 }
 0x132   :  { %v328_v10 = vadd.f32 %v1093_v9, %v327_v3 }
 0x134   :  { %v350_v15 = vadd.f32 %v349_v1, %v328_v10 }
 0x136   :  { %v356_v19 = vmax.f32 %v350_v15, 0.0 }
 0x139   :  { %v329_v12 = vpop.f32.mrf.mxu0 }
 0x13a   :  { %v330_v16 = vadd.f32 %v1093_v9, %v329_v12 }
 0x13c   :  { %v352_v18 = vadd.f32 %v351_v13, %v330_v16  ;;  %v373_v16 = vld [vmem:[#allocation3 + $0x20] sm:$0x1] }
 0x13e   :  { %v357_v21 = vmax.f32 %v352_v18, 0.0 }
 0x140   :  { %v1291_v22 = vpack.c.bf16 %v357_v21, %v356_v19 }
 0x141   :  { %v341_v23 = vpop.f32.mrf.mxu0 }
 0x142   :  { %1045 = vst [vmem:[#allocation3 + $0x18] sm:$0xff] %v1291_v22   ;;  %v342_v26 = vadd.f32 %v341_v23, %v320_v24  ;;  %v413_v41 = vshrl.u32 %v1291_v22, 16  ;;  %v416_v50 = vshll.u32 %v1291_v22, 16  ;;  %v427_v57 = vrot.slane %v1291_v22, 5 }
 0x144   :  { %v354_v30 = vmax.f32 %v342_v26, 0.0  ;;  %v415_v58 = vrot.slane %v413_v41, 4  ;;  %v418_v4 = vrot.slane %v416_v50, 5  ;;  %v428_v21 = vsel %vm110_vm2, %v425_v37, %v427_v57 }
 0x145   :  { %v553_v29 = vshrl.u32 %v428_v21, 16 }
 0x146   :  { %v419_v26 = vor.u32 %v418_v4, %v415_v58 }
 0x148   :  { %v420_v33 = vsel %vm72_vm1, %v410_v55, %v419_v26 }
 0x149   :  { %v343_v27 = vpop.f32.mrf.mxu0  ;;  %v1090_v32 = vld [vmem:[#allocation3 + $0x14] sm:$0xff]  }
 0x14a   :  { %v344_v28 = vadd.f32 %v343_v27, %v322_v25  ;;  %v422_v27 = vunpack.c.l.b16 %v373_v16  ;;  %v535_v39 = vshrl.u32 %v1090_v32, 16  ;;  %v538_v40 = vshll.u32 %v1090_v32, 16 }
 0x14c   :  { %v355_v31 = vmax.f32 %v344_v28, 0.0 }
 0x14e   :  { %v1022_v34 = vpack.c.bf16 %v355_v31, %v354_v30  ;;  %v556_v30 = vshll.u32 %v428_v21, 16 }
 0x150   :  { %1044 = vst [vmem:[#allocation3 + $0x8] sm:$0xff] %v1022_v34   ;;  %v424_v36 = vrot.slane %v1022_v34, 5  ;;  %v396_v35 = vshrl.u32 %v1022_v34, 16  ;;  %v399_v38 = vshll.u32 %v1022_v34, 16  ;;  %v423_v34 = vpack.c.b16 %v422_v27, %v422_v27 }
 0x152   :  { %v426_v42 = vsel %vm110_vm2, %v424_v36, %v425_v37  ;;  %v518_v43 = vshrl.u32 %v424_v36, 16  ;;  %v521_v44 = vshll.u32 %v424_v36, 16  ;;  %v398_v45 = vrot.slane %v396_v35, 4 }
 0x153   :  { %v526_v20 = vshrl.u32 %v426_v42, 16  ;;  %v529_v46 = vshll.u32 %v426_v42, 16  ;;  %v401_v47 = vrot.slane %v399_v38, 5  ;;  %v555_v36 = vrot.slane %v553_v29, 3 }
 0x154   :  { %v520_v48 = vrot.slane %v518_v43, 3  ;;  %v523_v49 = vrot.slane %v521_v44, 4  ;;  %v558_v35 = vrot.slane %v556_v30, 4  ;;  %v544_v37 = vshrl.u32 %v420_v33, 16 }
 0x155   :  { %v528_v52 = vrot.slane %v526_v20, 3  ;;  %v531_v53 = vrot.slane %v529_v46, 4  ;;  %v402_v54 = vor.u32 %v401_v47, %v398_v45  ;;  %v547_v38 = vshll.u32 %v420_v33, 16 }
 0x156   :  { %v524_v56 = vor.u32 %v523_v49, %v520_v48  ;;  %v429_v41 = vrot.slane %v423_v34, 5  ;;  %v559_v42 = vor.u32 %v558_v35, %v555_v36  ;;  %v546_v44 = vrot.slane %v544_v37, 3 }
 0x157   :  { %v1087_v59 = vld [vmem:[#allocation3 + $0x4] sm:$0xf0]   ;;  %v1089_v60 = vld [vmem:[#allocation3 + $0xc] sm:$0xff]   ;;  %v532_v61 = vor.u32 %v531_v53, %v528_v52  ;;  %v411_v62 = vsel %vm72_vm1, %v402_v54, %v410_v55  ;;  %v501_v63 = vshrl.u32 %v402_v54, 16  ;;  %v504_v0 = vshll.u32 %v402_v54, 16 }
 0x158   :  { %v1066_v1 = vor.u32 %v1087_v59, %v1065_v51  ;;  %v509_v2 = vshrl.u32 %v411_v62, 16  ;;  %v512_v3 = vshll.u32 %v411_v62, 16  ;;  %v492_v5 = vshrl.u32 %v1089_v60, 16 }
 0x159   :  { %v495_v6 = vshll.u32 %v1089_v60, 16  ;;  %v533_v7 = vsel %vm159_vm4, %v524_v56, %v532_v61  ;;  %v503_v8 = vrot.slane %v501_v63, 3  ;;  %v506_v11 = vrot.slane %v504_v0, 4 }
 0x15a   :  { %v484_v9 = vshrl.u32 %v1066_v1, 16  ;;  %v487_v10 = vshll.u32 %v1066_v1, 16  ;;  %793 = vmatmul.bf16.vlgmr.msrb.gmra.mxu1 %v533_v7  ;;  %v511_v12 = vrot.slane %v509_v2, 3  ;;  %v494_v13 = vrot.slane %v492_v5, 3 }
 0x15b   :  { %v497_v14 = vrot.slane %v495_v6, 4  ;;  %v514_v15 = vrot.slane %v512_v3, 4  ;;  %v507_v19 = vor.u32 %v506_v11, %v503_v8  ;;  %v560_v43 = vsel %vm159_vm4, %v532_v61, %v559_v42 }
 0x15c   :  { %v486_v17 = vrot.slane %v484_v9, 3  ;;  %v489_v18 = vrot.slane %v487_v10, 4  ;;  %v549_v45 = vrot.slane %v547_v38, 4  ;;  %v537_v20 = vrot.slane %v535_v39, 3  ;;  %v1094_v9 = vld [vmem:[%s1333_s4] ss:$0 sm:$0xff] }
 0x15d   :  { %v498_v23 = vor.u32 %v497_v14, %v494_v13  ;;  %v515_v24 = vor.u32 %v514_v15, %v511_v12  ;;  %v540_v46 = vrot.slane %v538_v40, 4  ;;  %v430_v47 = vsel %vm110_vm2, %v427_v57, %v429_v41 }
 0x15e   :  { %v490_v25 = vor.u32 %v489_v18, %v486_v17  ;;  %v550_v48 = vor.u32 %v549_v45, %v546_v44  ;;  %v580_v49 = vshrl.u32 %v430_v47, 16  ;;  %v583_v50 = vshll.u32 %v430_v47, 16 }
 0x15f   :  { %v516_v28 = vsel %vm159_vm4, %v507_v19, %v515_v24  ;;  %v541_v51 = vor.u32 %v540_v46, %v537_v20  ;;  %v1040_v52 = vunpack.c.h.b16 %v1291_v22  ;;  %v571_v59 = vshrl.u32 %v419_v26, 16 }
 0x160   :  { %v499_v31 = vsel %vm159_vm4, %v490_v25, %v498_v23  ;;  %771 = vmatmul.bf16.vlgmr.msra.gmra.mxu3 %v516_v28  ;;  %v551_v53 = vsel %vm159_vm4, %v515_v24, %v550_v48  ;;  %v582_v55 = vrot.slane %v580_v49, 3  ;;  %v585_v56 = vrot.slane %v583_v50, 4 }
 0x161   :  { %749 = vmatmul.bf16.vlgmr.msra.gmra.mxu2 %v499_v31  ;;  %v542_v54 = vsel %vm159_vm4, %v498_v23, %v541_v51  ;;  %v391_v58 = vpack.c.b16 %v1040_v52, %v1040_v52  ;;  %v574_v60 = vshll.u32 %v419_v26, 16  ;;  %v573_v63 = vrot.slane %v571_v59, 3 }
 0x162   :  { %v586_v61 = vor.u32 %v585_v56, %v582_v55 }
 0x163   :  { %v562_v62 = vshrl.u32 %v391_v58, 16  ;;  %v565_v57 = vshll.u32 %v391_v58, 16  ;;  %v576_v0 = vrot.slane %v574_v60, 4 }
 0x164   :  { %v587_v1 = vsel %vm159_vm4, %v559_v42, %v586_v61 }
 0x165   :  { %v564_v2 = vrot.slane %v562_v62, 3  ;;  %v567_v22 = vrot.slane %v565_v57, 4  ;;  %v577_v3 = vor.u32 %v576_v0, %v573_v63 }
 0x167   :  { %v568_v4 = vor.u32 %v567_v22, %v564_v2  ;;  %v578_v5 = vsel %vm159_vm4, %v550_v48, %v577_v3 }
 0x169   :  { %v569_v6 = vsel %vm159_vm4, %v541_v51, %v568_v4 }
 0x16a   :  { %798 = vmatmul.bf16.gmra.mxu1 %v560_v43 }
 0x170   :  { %776 = vmatmul.bf16.gmra.mxu3 %v551_v53 }
 0x171   :  { %754 = vmatmul.bf16.gmra.mxu2 %v542_v54 }
 0x17a   :  { %801 = vmatmul.bf16.gmra.mxu1 %v587_v1 }
 0x180   :  { %779 = vmatmul.bf16.gmra.mxu3 %v578_v5 }
 0x181   :  { %757 = vmatmul.bf16.gmra.mxu2 %v569_v6 }
 0x1d7   :  { %v794_v7 = vpop.f32.mrf.mxu1 }
 0x1df   :  { %v796_v8 = vpop.f32.mrf.mxu1 }
 0x1e3   :  { %v772_v10 = vpop.f32.mrf.mxu3 }
 0x1e4   :  { %v750_v11 = vpop.f32.mrf.mxu2 }
 0x1e5   :  { %v751_v12 = vadd.f32 %v1094_v9, %v750_v11 }
 0x1e7   :  { %v773_v13 = vadd.f32 %v772_v10, %v751_v12  ;;  %v799_v14 = vpop.f32.mrf.mxu1 }
 0x1e9   :  { %v795_v15 = vadd.f32 %v794_v7, %v773_v13 }
 0x1eb   :  { %v807_v16 = vmax.f32 %v795_v15, 0.0  ;;  %v774_v17 = vpop.f32.mrf.mxu3 }
 0x1ec   :  { %v752_v18 = vpop.f32.mrf.mxu2 }
 0x1ed   :  { %811 = vst [vmem:[%s1334_s5] sm:$0xff] %v807_v16  ;;  %v753_v19 = vadd.f32 %v1094_v9, %v752_v18 }
 0x1ef   :  { %v775_v21 = vadd.f32 %v774_v17, %v753_v19  ;;  %v800_v23 = vpop.f32.mrf.mxu1 }
 0x1f1   :  { %v797_v24 = vadd.f32 %v796_v8, %v775_v21 }
 0x1f3   :  { %v808_v25 = vmax.f32 %v797_v24, 0.0  ;;  %v777_v26 = vpop.f32.mrf.mxu3 }
 0x1f4   :  { %v755_v27 = vpop.f32.mrf.mxu2 }
 0x1f5   :  { %812 = vst [vmem:[%s1334_s5 + $0x8] sm:$0xff] %v808_v25 }
 0x1f7   :  { %v802_v33 = vpop.f32.mrf.mxu1 }
 0x1fb   :  { %v778_v28 = vpop.f32.mrf.mxu3 }
 0x1fc   :  { %v756_v29 = vpop.f32.mrf.mxu2 }
 0x1ff   :  { %v804_v41 = vpop.f32.mrf.mxu1 }
 0x203   :  { %v780_v31 = vpop.f32.mrf.mxu3 }
 0x204   :  { %v758_v30 = vpop.f32.mrf.mxu2 }
 0x205   :  { %v759_v32 = vadd.f32 %v1094_v9, %v758_v30 }
 0x207   :  { %v781_v34 = vadd.f32 %v780_v31, %v759_v32 }
 0x209   :  { %v803_v36 = vadd.f32 %v802_v33, %v781_v34 }
 0x20b   :  { %v809_v35 = vmax.f32 %v803_v36, 0.0  ;;  %v782_v39 = vpop.f32.mrf.mxu3 }
 0x20c   :  { %v760_v37 = vpop.f32.mrf.mxu2 }
 0x20d   :  { %969 = vst [vmem:[%s1334_s5 + $0x10] sm:$0xff] %v809_v35  ;;  %v761_v38 = vadd.f32 %v1094_v9, %v760_v37 }
 0x20f   :  { %v783_v40 = vadd.f32 %v782_v39, %v761_v38 }
 0x211   :  { %v805_v42 = vadd.f32 %v804_v41, %v783_v40 }
 0x213   :  { %v810_v43 = vmax.f32 %v805_v42, 0.0 }
 0x215   :  { %970 = vst [vmem:[%s1334_s5 + $0x18] sm:$0xff] %v810_v43 }

</bundles_post_ra>
